<compile_context>
chip_gen: v6e
topology: v6e:2x2x1
jax: 0.10.0
libtpu: 0.0.40
codegen_flags: <defaults>
</compile_context>

<pallas_src>
import functools

import jax
import jax.numpy as jnp
from jax import lax
from jax.experimental import pallas as pl
from jax.experimental.pallas import tpu as pltpu

O_PAD = 128          # lane-dense output width; real out_dim sliced back in wrapper
ISSUE_UNROLL = 4     # manual unroll factor for the HBM-gather DMA issue loop


# ---------------------------------------------------------------------------
# Path A: table resident in VMEM, on-chip gather via one-hot MXU matmul.
# ---------------------------------------------------------------------------
def _resident_kernel(idx_ref, tbl_ref, w_ref, b_ref, o_ref):
    # idx_ref: VMEM (TB, 2) int32 tile   tbl_ref: VMEM (V, E) f32 (resident)
    # w_ref:   VMEM (E, O_PAD) f32       b_ref:   VMEM (1, O_PAD) f32
    # o_ref:   VMEM (TB, O_PAD) f32
    tb = o_ref.shape[0]
    V = tbl_ref.shape[0]

    idx = idx_ref[...]                                      # (TB, 2) int32
    iota_v = lax.broadcasted_iota(jnp.int32, (tb, V), 1)    # (TB, V)
    oh0 = (iota_v == idx[:, 0:1]).astype(jnp.float32)       # one-hot selectors
    oh1 = (iota_v == idx[:, 1:2]).astype(jnp.float32)

    tbl = tbl_ref[...]                                      # (V, E)
    e0 = jnp.dot(oh0, tbl, preferred_element_type=jnp.float32)   # gather on MXU
    e1 = jnp.dot(oh1, tbl, preferred_element_type=jnp.float32)
    h = e0 * e1                                             # (TB, E)

    logits = jnp.dot(h, w_ref[...], preferred_element_type=jnp.float32) + b_ref[...]
    o_ref[...] = jax.nn.sigmoid(logits)                     # EUP exp path


# ---------------------------------------------------------------------------
# Path B: table in HBM, manual row-gather DMAs with bulk wait + double buffer.
# ---------------------------------------------------------------------------
def _hbm_gather_kernel(idx_ref, emb_hbm, w_ref, b_ref, o_ref, gbuf, sems):
    # idx_ref: SMEM (2*B_pad,) int32, scalar-prefetched (tile i needs tile i+1's
    #          indices to issue the lookahead gathers -> full-batch prefetch).
    # emb_hbm: HBM (V, E) f32 (memory_space=pl.ANY; gathered manually)
    # gbuf:    VMEM (2, 2*TB, E) f32 double-buffered gather scratch;
    #          per slot: rows [0,TB) = e0 rows, rows [TB,2TB) = e1 rows.
    # sems:    DMA semaphore array (2,), one per buffer slot.
    i = pl.program_id(0)
    n = pl.num_programs(0)
    tb = o_ref.shape[0]

    def issue_tile(t, slot):
        # Start 2*TB row-gather DMAs for batch tile t into buffer `slot`.
        base = 2 * t * tb

        @pl.loop(0, tb // ISSUE_UNROLL)
        def _issue(j):
            for u in range(ISSUE_UNROLL):            # manual unroll (python inline)
                row = ISSUE_UNROLL * j + u
                g = base + 2 * row
                pltpu.make_async_copy(
                    emb_hbm.at[pl.ds(idx_ref[g], 1), :],
                    gbuf.at[slot, pl.ds(row, 1), :],
                    sems.at[slot]).start()
                pltpu.make_async_copy(
                    emb_hbm.at[pl.ds(idx_ref[g + 1], 1), :],
                    gbuf.at[slot, pl.ds(tb + row, 1), :],
                    sems.at[slot]).start()

    slot = i % 2

    # Prime the pipeline: the very first tile gathers into slot 0.
    @pl.when(i == 0)
    def _():
        issue_tile(0, 0)

    # ONE bulk wait per tile: the wait descriptor spans the whole slot buffer
    # (2*TB*E*4 bytes), which is exactly the sum of the 2*TB row-gather signals,
    # so a single wait drains the slot (DMA semaphores count bytes).
    pltpu.make_async_copy(gbuf.at[slot], gbuf.at[slot], sems.at[slot]).wait()

    # Prefetch the NEXT tile's rows into the other slot while this tile computes
    # and its output DMA drains (cross-tile double buffering).
    @pl.when(i + 1 < n)
    def _():
        issue_tile(i + 1, 1 - slot)

    e0 = gbuf[slot, :tb, :]                                  # (TB, E)
    e1 = gbuf[slot, tb:, :]                                  # (TB, E)
    h = e0 * e1
    logits = jnp.dot(h, w_ref[...], preferred_element_type=jnp.float32) + b_ref[...]
    o_ref[...] = jax.nn.sigmoid(logits)


# ---------------------------------------------------------------------------
# Wrapper
# ---------------------------------------------------------------------------
def pad_output_params(w_out, b_out):
    """One-time (init-path) padding of the output projection to a lane-dense slab."""
    E, out_dim = w_out.shape
    w_pad = jnp.zeros((E, O_PAD), jnp.float32).at[:, :out_dim].set(w_out)
    b_pad = jnp.zeros((1, O_PAD), jnp.float32).at[:, :out_dim].set(b_out)
    return w_pad, b_pad


@functools.partial(
    jax.jit,
    static_argnames=("out_dim", "tb", "force_hbm_gather", "use_core_parallel"))
def srn2vec_forward(x_idx, emb_table, w_pad, b_pad, *, out_dim, tb=256,
                    force_hbm_gather=False, use_core_parallel=False):
    """x_idx: (B,2) int; emb_table: (V,E) f32; w_pad: (E,O_PAD); b_pad: (1,O_PAD)."""
    B = x_idx.shape[0]
    V, E = emb_table.shape

    # Batch tile: default 256 rows (fills the 256-wide v6e/v7x MXU M dimension
    # and amortizes per-grid-step overhead); tiny batches round up to a sublane
    # multiple instead.
    TB = tb if B >= tb else max(8, -(-B // 8) * 8)
    B_pad = -(-B // TB) * TB

    # Vectorized clamp once in the wrapper (not in the kernel's scalar path).
    # NOTE: out-of-range indices are silently clamped to [0, V-1]; PyTorch's
    # nn.Embedding would raise instead.
    idx = jnp.clip(x_idx.astype(jnp.int32), 0, V - 1)
    if B_pad != B:
        # Padded rows gather row 0 and are sliced off below (wasted work only).
        idx = jnp.pad(idx, ((0, B_pad - B), (0, 0)))

    grid = (B_pad // TB,)
    table_bytes = V * E * emb_table.dtype.itemsize
    # Resident-table budget kept conservative for v7x (64 MiB physical VMEM,
    # 32 MiB scoped default); v5e/v6e (128 MiB) could go higher.
    resident_ok = (table_bytes <= (16 << 20)) and not force_hbm_gather

    if resident_ok:
        # Resident table (possibly double-buffered by the pipeline) + tiles;
        # never request below the scoped default.
        vmem_limit = int(min(100 << 20, max(32 << 20, 2 * table_bytes + (8 << 20))))
        sem = ((pltpu.CORE_PARALLEL,) if use_core_parallel else ("parallel",))
        out = pl.pallas_call(
            _resident_kernel,
            out_shape=jax.ShapeDtypeStruct((B_pad, O_PAD), jnp.float32),
            grid_spec=pltpu.PrefetchScalarGridSpec(
                num_scalar_prefetch=0,
                grid=grid,
                in_specs=[
                    pl.BlockSpec((TB, 2), lambda i: (i, 0)),      # per-tile indices
                    pl.BlockSpec((V, E), lambda i: (0, 0)),       # resident table
                    pl.BlockSpec((E, O_PAD), lambda i: (0, 0)),   # w (resident)
                    pl.BlockSpec((1, O_PAD), lambda i: (0, 0)),   # b (resident)
                ],
                out_specs=pl.BlockSpec((TB, O_PAD), lambda i: (i, 0)),
            ),
            compiler_params=pltpu.CompilerParams(
                dimension_semantics=sem,
                vmem_limit_bytes=vmem_limit),
        )(idx, emb_table, w_pad, b_pad)
    else:
        # TODO(synk): full-batch scalar prefetch of indices is bounded by SMEM
        # capacity; for very large B chunk the batch in the caller.
        idx_flat = idx.reshape(-1)                            # (2*B_pad,) -> SMEM
        vmem_limit = int(min(100 << 20, max(32 << 20, 4 * TB * E * 4 + (8 << 20))))
        out = pl.pallas_call(
            _hbm_gather_kernel,
            out_shape=jax.ShapeDtypeStruct((B_pad, O_PAD), jnp.float32),
            grid_spec=pltpu.PrefetchScalarGridSpec(
                num_scalar_prefetch=1,
                grid=grid,
                in_specs=[
                    pl.BlockSpec(memory_space=pl.ANY),                  # table in HBM
                    pl.BlockSpec((E, O_PAD), lambda i, idx_s: (0, 0)),  # w (resident)
                    pl.BlockSpec((1, O_PAD), lambda i, idx_s: (0, 0)),  # b (resident)
                ],
                out_specs=pl.BlockSpec((TB, O_PAD), lambda i, idx_s: (i, 0)),
                scratch_shapes=[
                    pltpu.VMEM((2, 2 * TB, E), jnp.float32),   # double-buffered gather
                    pltpu.SemaphoreType.DMA((2,)),             # one DMA sem per slot
                ],
            ),
            compiler_params=pltpu.CompilerParams(
                # Cross-tile double buffering carries DMA state across steps.
                dimension_semantics=("arbitrary",),
                vmem_limit_bytes=vmem_limit),
        )(idx_flat, emb_table, w_pad, b_pad)

    return out[:B, :out_dim]


def srn2vec_reference(x_idx, emb_table, w_out, b_out):
    emb = emb_table[x_idx]                       # (B, 2, E) exact gather
    h = emb[:, 0, :] * emb[:, 1, :]              # (B, E)
    logits = jnp.dot(h, w_out, precision=jax.lax.Precision.HIGHEST) + b_out
    return jax.nn.sigmoid(logits)                # (B, out_dim)


if __name__ == "__main__":
    # Small, deterministic synthetic setup consistent with the module:
    # vocab (len(network.line_graph.nodes)) = 64, emb_dim = 128, out_dim = 2.
    # B=500 exercises a 2-tile grid (TB=256) plus batch padding.
    V, E, OUT_DIM, B = 64, 128, 2, 500

    key = jax.random.PRNGKey(0)
    k_emb, k_w, k_b, k_idx = jax.random.split(key, 4)

    # nn.Embedding ~ N(0,1); nn.Linear ~ U(-1/sqrt(E), 1/sqrt(E)).
    emb_table = jax.random.normal(k_emb, (V, E), dtype=jnp.float32)
    bound = 1.0 / jnp.sqrt(E)
    w_out = jax.random.uniform(k_w, (E, OUT_DIM), jnp.float32, -bound, bound)
    b_out = jax.random.uniform(k_b, (OUT_DIM,), jnp.float32, -bound, bound)
    # lin_vx / lin_vy exist in __init__ but are unused in forward -> no params.

    w_pad, b_pad = pad_output_params(w_out, b_out)   # one-time init-path padding
    w_pad, b_pad = jax.block_until_ready((w_pad, b_pad))

    x_idx = jax.random.randint(k_idx, (B, 2), 0, V, dtype=jnp.int32)

    ref = srn2vec_reference(x_idx, emb_table, w_out, b_out)
    # Tolerance note: MXU matmuls may run reduced-precision passes for f32
    # inputs depending on the default matmul precision, giving O(1e-3) output
    # differences; genuine gather/compute bugs produce O(1e-1) errors.
    TOL = 5e-3

    # Path A: resident-table (default for this 32 KiB table).
    y_res = srn2vec_forward(x_idx, emb_table, w_pad, b_pad, out_dim=OUT_DIM)
    y_res = jax.block_until_ready(y_res)
    assert y_res.shape == (B, OUT_DIM)
    err_res = float(jnp.max(jnp.abs(y_res - ref)))
    assert err_res < TOL, f"resident path max |err| = {err_res}"

    # Path B: HBM row-gather (forced, to exercise the large-vocab path too).
    y_hbm = srn2vec_forward(x_idx, emb_table, w_pad, b_pad, out_dim=OUT_DIM,
                            force_hbm_gather=True)
    y_hbm = jax.block_until_ready(y_hbm)
    assert y_hbm.shape == (B, OUT_DIM)
    err_hbm = float(jnp.max(jnp.abs(y_hbm - ref)))
    assert err_hbm < TOL, f"hbm-gather path max |err| = {err_hbm}"

    print("KERNEL_OK")
</pallas_src>

<mosaic_0001>
module attributes {stable_mosaic.version = 11 : i64} {
  func.func @_resident_kernel(%arg0: i32, %arg1: memref<256x2xi32, #tpu.memory_space<vmem>>, %arg2: memref<64x128xf32, #tpu.memory_space<vmem>>, %arg3: memref<128x128xf32, #tpu.memory_space<vmem>>, %arg4: memref<1x128xf32, #tpu.memory_space<vmem>>, %arg5: memref<256x128xf32, #tpu.memory_space<vmem>>) attributes {dimension_semantics = [#tpu.dimension_semantics<parallel>], iteration_bounds = array<i64: 2>, scalar_prefetch = 0 : i64, scratch_operands = 0 : i64, tpu.core_type = #tpu.core_type<tc>, window_params = [{transform_indices = @transform_0, window_bounds = array<i64: 256, 2>}, {pipeline_mode = #tpu.pipeline_mode<synchronous>, transform_indices = @transform_1, window_bounds = array<i64: 64, 128>}, {pipeline_mode = #tpu.pipeline_mode<synchronous>, transform_indices = @transform_2, window_bounds = array<i64: 128, 128>}, {pipeline_mode = #tpu.pipeline_mode<synchronous>, transform_indices = @transform_3, window_bounds = array<i64: 1, 128>}, {transform_indices = @transform_4, window_bounds = array<i64: 256, 128>}]} {
    %c0 = arith.constant 0 : index
    %c0_0 = arith.constant 0 : index
    %0 = vector.load %arg1[%c0, %c0_0] : memref<256x2xi32, #tpu.memory_space<vmem>>, vector<256x2xi32>
    %1 = tpu.iota {dimensions = array<i32: 1>} : vector<256x64xi32>
    %2 = vector.extract_strided_slice %0 {offsets = [0, 0], sizes = [256, 1], strides = [1, 1]} : vector<256x2xi32> to vector<256x1xi32>
    %3 = vector.broadcast %2 : vector<256x1xi32> to vector<256x64xi32>
    %4 = arith.cmpi eq, %1, %3 : vector<256x64xi32>
    %5 = arith.extui %4 : vector<256x64xi1> to vector<256x64xi32>
    %6 = arith.sitofp %5 : vector<256x64xi32> to vector<256x64xf32>
    %7 = vector.extract_strided_slice %0 {offsets = [0, 1], sizes = [256, 1], strides = [1, 1]} : vector<256x2xi32> to vector<256x1xi32>
    %8 = vector.broadcast %7 : vector<256x1xi32> to vector<256x64xi32>
    %9 = arith.cmpi eq, %1, %8 : vector<256x64xi32>
    %10 = arith.extui %9 : vector<256x64xi1> to vector<256x64xi32>
    %11 = arith.sitofp %10 : vector<256x64xi32> to vector<256x64xf32>
    %c0_1 = arith.constant 0 : index
    %c0_2 = arith.constant 0 : index
    %12 = vector.load %arg2[%c0_1, %c0_2] : memref<64x128xf32, #tpu.memory_space<vmem>>, vector<64x128xf32>
    %cst = arith.constant dense<0.000000e+00> : vector<256x128xf32>
    %13 = tpu.matmul %6, %12, %cst {dimension_numbers = #tpu.dot_dimension_numbers<[1], [0], [0], [1], [0, 0, 1, 1], [], []>} : vector<256x64xf32>, vector<64x128xf32>, vector<256x128xf32> -> vector<256x128xf32>
    %cst_3 = arith.constant dense<0.000000e+00> : vector<256x128xf32>
    %14 = tpu.matmul %11, %12, %cst_3 {dimension_numbers = #tpu.dot_dimension_numbers<[1], [0], [0], [1], [0, 0, 1, 1], [], []>} : vector<256x64xf32>, vector<64x128xf32>, vector<256x128xf32> -> vector<256x128xf32>
    %15 = arith.mulf %13, %14 : vector<256x128xf32>
    %c0_4 = arith.constant 0 : index
    %c0_5 = arith.constant 0 : index
    %16 = vector.load %arg3[%c0_4, %c0_5] : memref<128x128xf32, #tpu.memory_space<vmem>>, vector<128x128xf32>
    %cst_6 = arith.constant dense<0.000000e+00> : vector<256x128xf32>
    %17 = tpu.matmul %15, %16, %cst_6 {dimension_numbers = #tpu.dot_dimension_numbers<[1], [0], [0], [1], [0, 0, 1, 1], [], []>} : vector<256x128xf32>, vector<128x128xf32>, vector<256x128xf32> -> vector<256x128xf32>
    %c0_7 = arith.constant 0 : index
    %c0_8 = arith.constant 0 : index
    %18 = vector.load %arg4[%c0_7, %c0_8] : memref<1x128xf32, #tpu.memory_space<vmem>>, vector<1x128xf32>
    %19 = vector.broadcast %18 : vector<1x128xf32> to vector<256x128xf32>
    %20 = arith.addf %17, %19 : vector<256x128xf32>
    %21 = arith.negf %20 : vector<256x128xf32>
    %22 = math.exp %21 : vector<256x128xf32>
    %cst_9 = arith.constant 1.000000e+00 : f32
    %23 = vector.broadcast %cst_9 : f32 to vector<256x128xf32>
    %24 = arith.addf %23, %22 : vector<256x128xf32>
    %25 = arith.divf %23, %24 : vector<256x128xf32>
    %c0_10 = arith.constant 0 : index
    %c0_11 = arith.constant 0 : index
    %26 = vector.load %arg5[%c0_10, %c0_11] : memref<256x128xf32, #tpu.memory_space<vmem>>, vector<256x128xf32>
    tpu.vector_store %arg5[%c0_10, %c0_11], %25 {strides = array<i32>} : memref<256x128xf32, #tpu.memory_space<vmem>>, vector<256x128xf32>,
    return
  }
  func.func @transform_0(%arg0: i32) -> (i32, i32) {
    %c0_i32 = arith.constant 0 : i32
    %c0_i32_0 = arith.constant 0 : i32
    return %arg0, %c0_i32 : i32, i32
  }
  func.func @transform_1(%arg0: i32) -> (i32, i32) {
    %c0_i32 = arith.constant 0 : i32
    %c0_i32_0 = arith.constant 0 : i32
    %c0_i32_1 = arith.constant 0 : i32
    return %c0_i32, %c0_i32_0 : i32, i32
  }
  func.func @transform_2(%arg0: i32) -> (i32, i32) {
    %c0_i32 = arith.constant 0 : i32
    %c0_i32_0 = arith.constant 0 : i32
    %c0_i32_1 = arith.constant 0 : i32
    return %c0_i32, %c0_i32_0 : i32, i32
  }
  func.func @transform_3(%arg0: i32) -> (i32, i32) {
    %c0_i32 = arith.constant 0 : i32
    %c0_i32_0 = arith.constant 0 : i32
    %c0_i32_1 = arith.constant 0 : i32
    return %c0_i32, %c0_i32_0 : i32, i32
  }
  func.func @transform_4(%arg0: i32) -> (i32, i32) {
    %c0_i32 = arith.constant 0 : i32
    %c0_i32_0 = arith.constant 0 : i32
    return %arg0, %c0_i32 : i32, i32
  }
}

</mosaic_0001>

<bundles_post_ra>
// kernel: srn2vec_forward.1
= control target key start
LH: loop header
LB: loop body
LE: loop exit
PB: predicated region body
PF: predicated region fallthrough
CT: control target
= control target key end

     0   :  { %s2533_s15 = smov 0   ;;  %s3104_s0 = inlined_call_operand.vmem [shape: s32[512,2], index: 0, kind: input, shape index: {}]   ;;  %s3105_s1 = inlined_call_operand.vmem [shape: f32[64,128], index: 1, kind: input, shape index: {}]   ;;  %s3106_s2 = inlined_call_operand.vmem [shape: f32[128,128], index: 2, kind: input, shape index: {}]   ;;  %s3107_s3 = inlined_call_operand.vmem [shape: f32[1,128], index: 3, kind: input, shape index: {}]   ;;  %s3108_s4 = inlined_call_operand.vmem [shape: f32[512,128], index: 4, kind: output, shape index: {}]  }
   0x1 LB: > { %s1830_s16 = sadd.s32 4294967295, %s2503_s15   ;;  %p1834_p0 = scmp.ge.s32.totalorder %s2503_s15, 1  ;;  %s2503_s15 = sphi %s2533_s15, %s14_s15  }
   0x2   : > { %p163_p1 = scmp.lt.s32.totalorder %s2503_s15, 3 }
   0x4   : > { %p164_p2 = pnand %p1834_p0, %p163_p1 }
   0x5   : > { %s1835_s17 = sshll.u32 (!%p164_p2), %s1830_s16, 5 }
   0x6   : > { %167 = sbr.rel (%p164_p2) target bundleno = 699 (0x2bb), region = 36  ;;  %p190_p3 = scmp.lt.s32.totalorder (!%p164_p2), %s1835_s17, 63 }
   0xb   : > { %v2544_v0 = vld [vmem:[%s3105_s1 + $0x38] sm:$0xff]  ;;  %v2505_v1 = vmov 0   ;;  %v2549_v2 = vld [vmem:[%s3105_s1 + $0x30] sm:$0xff]  ;;  %s3110_s17 = smov (!%p190_p3, %s1835_s17), 63  ;;  %v2559_v3 = vld [vmem:[%s3105_s1 + $0x28] sm:$0xff]  ;;  %v2506_v26 = vmov 1   ;;  %v233_v42 = vlaneseq }
   0xc   : > { %2366 = vset.pattern.permute.xlu1 %v2505_v1  ;;  %2365 = vset.pattern.permute.xlu0 %v2505_v1  ;;  %s1836_s24 = sshll.u32 %s3110_s17, 3  ;;  %v2578_v4 = vld [vmem:[%s3105_s1 + $0x20] sm:$0xff]  ;;  %v2594_v7 = vld [vmem:[%s3105_s1 + $0x18] sm:$0xff]  ;;  %v2610_v10 = vld [vmem:[%s3105_s1 + $0x10] sm:$0xff]  ;;  %vm627_vm0 = vcmask 523264   ;;  %v2507_v46 = vmov 0.0  }
   0xd   : > { %2338 = vmatprep.subr.mxu1 %v2544_v0  ;;  %2130 = vmatprep.subr.mxu0 %v2544_v0  ;;  %s2572_s27 = scalar_lea.vmem %s3104_s0, %s1836_s24  ;;  %v2627_v13 = vld [vmem:[%s3105_s1 + $0x8] sm:$0xff]  ;;  %v2644_v16 = vld [vmem:[%s3105_s1] sm:$0xff]  ;;  %v2716_v43 = vand.u32 127, %v233_v42  ;;  %s3043_s28 = scalar_lea.vmem %s3108_s4, %s1836_s24 }
   0xe   : > { %2346 = vmatpush3.msra.mxu1 %v2544_v0  ;;  %2131 = vmatpush3.msra.mxu0 %v2544_v0  ;;  %v2582_v5 = vld [vmem:[%s2572_s27 + $0x90] sm:$0xff]  ;;  %v2585_v6 = vld [vmem:[%s2572_s27 + $0x80] sm:$0xff]  ;;  %v2597_v8 = vld [vmem:[%s2572_s27 + $0x98] sm:$0xff] }
   0xf   : > { %2339 = vmatprep.subr.mxu1 %v2549_v2  ;;  %2132 = vmatprep.subr.mxu0 %v2549_v2  ;;  %v2600_v9 = vld [vmem:[%s2572_s27 + $0x88] sm:$0xff]  ;;  %v2619_v12 = vld [vmem:[%s2572_s27 + $0xa0] sm:$0xff]  ;;  %v2635_v14 = vld [vmem:[%s2572_s27 + $0xb8] sm:$0xff] }
  0x10   : > { %2347 = vmatpush3.msra.mxu1 %v2549_v2  ;;  %2133 = vmatpush3.msra.mxu0 %v2549_v2  ;;  %v2616_v11 = vld [vmem:[%s2572_s27 + $0xa8] sm:$0xff]  ;;  %v2638_v15 = vld [vmem:[%s2572_s27 + $0xb0] sm:$0xff]  ;;  %v2657_v18 = vld [vmem:[%s2572_s27 + $0xc0] sm:$0xff] }
  0x11   : > { %2340 = vmatprep.subr.mxu1 %v2559_v3  ;;  %2134 = vmatprep.subr.mxu0 %v2559_v3  ;;  %v2654_v17 = vld [vmem:[%s2572_s27 + $0xc8] sm:$0xff]  ;;  %v2665_v19 = vld [vmem:[%s2572_s27 + $0xd8] sm:$0xff]  ;;  %v2668_v20 = vld [vmem:[%s2572_s27 + $0xd0] sm:$0xff] }
  0x12   : > { %2348 = vmatpush3.msra.mxu1 %v2559_v3  ;;  %2135 = vmatpush3.msra.mxu0 %v2559_v3  ;;  %v2673_v21 = vld [vmem:[%s2572_s27 + $0xe8] sm:$0xff]  ;;  %v2676_v22 = vld [vmem:[%s2572_s27 + $0xe0] sm:$0xff]  ;;  %v2681_v23 = vld [vmem:[%s2572_s27 + $0xf8] sm:$0xff] }
  0x13   : > { %290 = vperm.xlu1 %2366, %v2582_v5   ;;  %284 = vperm.xlu0 %2365, %v2585_v6   ;;  %v2684_v24 = vld [vmem:[%s2572_s27 + $0xf0] sm:$0xff]  ;;  %v201_v25 = vld [vmem:[%s2572_s27] sm:$0xff]  ;;  %v202_v27 = vld [vmem:[%s2572_s27 + $0x8] sm:$0xff] }
  0x14   : > { %2341 = vmatprep.subr.mxu1 %v2578_v4  ;;  %2136 = vmatprep.subr.mxu0 %v2578_v4  ;;  %v203_v28 = vld [vmem:[%s2572_s27 + $0x10] sm:$0xff]  ;;  %v204_v29 = vld [vmem:[%s2572_s27 + $0x18] sm:$0xff]  ;;  %v205_v30 = vld [vmem:[%s2572_s27 + $0x20] sm:$0xff] }
  0x15   : > { %2349 = vmatpush3.msra.mxu1 %v2578_v4  ;;  %2137 = vmatpush3.msra.mxu0 %v2578_v4  ;;  %v206_v31 = vld [vmem:[%s2572_s27 + $0x28] sm:$0xff]  ;;  %v207_v32 = vld [vmem:[%s2572_s27 + $0x30] sm:$0xff]  ;;  %v208_v33 = vld [vmem:[%s2572_s27 + $0x38] sm:$0xff] }
  0x16   : > { %2342 = vmatprep.subr.mxu1 %v2594_v7  ;;  %2138 = vmatprep.subr.mxu0 %v2594_v7  ;;  %v209_v34 = vld [vmem:[%s2572_s27 + $0x40] sm:$0xff]  ;;  %v210_v35 = vld [vmem:[%s2572_s27 + $0x48] sm:$0xff]  ;;  %v211_v36 = vld [vmem:[%s2572_s27 + $0x50] sm:$0xff] }
  0x17   : > { %293 = vperm.xlu1 %2366, %v2597_v8   ;;  %287 = vperm.xlu0 %2365, %v2600_v9   ;;  %v212_v37 = vld [vmem:[%s2572_s27 + $0x58] sm:$0xff]  ;;  %v213_v38 = vld [vmem:[%s2572_s27 + $0x60] sm:$0xff]  ;;  %v214_v39 = vld [vmem:[%s2572_s27 + $0x68] sm:$0xff] }
  0x18   : > { %2350 = vmatpush3.msra.mxu1 %v2594_v7  ;;  %2139 = vmatpush3.msra.mxu0 %v2594_v7  ;;  %v215_v40 = vld [vmem:[%s2572_s27 + $0x70] sm:$0xff]  ;;  %v216_v41 = vld [vmem:[%s2572_s27 + $0x78] sm:$0xff] }
  0x19   : > { %2343 = vmatprep.subr.mxu1 %v2610_v10  ;;  %2140 = vmatprep.subr.mxu0 %v2610_v10 }
  0x1a   : > { %2351 = vmatpush3.msra.mxu1 %v2610_v10  ;;  %2141 = vmatpush3.msra.mxu0 %v2610_v10 }
  0x1b   : > { %299 = vperm.xlu1 %2366, %v2616_v11   ;;  %296 = vperm.xlu0 %2365, %v2619_v12  }
  0x1c   : > { %2344 = vmatprep.subr.mxu1 %v2627_v13  ;;  %2142 = vmatprep.subr.mxu0 %v2627_v13 }
  0x1d   : > { %2352 = vmatpush3.msra.mxu1 %v2627_v13  ;;  %2143 = vmatpush3.msra.mxu0 %v2627_v13 }
  0x1e   : > { %2345 = vmatprep.subr.mxu1 %v2644_v16  ;;  %2144 = vmatprep.subr.mxu0 %v2644_v16 }
  0x1f   : > { %305 = vperm.xlu1 %2366, %v2635_v14   ;;  %302 = vperm.xlu0 %2365, %v2638_v15  }
  0x20   : > { %2353 = vmatpush3.msra.mxu1 %v2644_v16  ;;  %2145 = vmatpush3.msra.mxu0 %v2644_v16 }
  0x21   : > { %2194 = vmatprep.subr.mxu1 %v2544_v0 }
  0x23   : > { %311 = vperm.xlu1 %2366, %v2654_v17   ;;  %308 = vperm.xlu0 %2365, %v2657_v18  }
  0x27   : > { %317 = vperm.xlu1 %2366, %v2665_v19   ;;  %314 = vperm.xlu0 %2365, %v2668_v20  }
  0x2b   : > { %323 = vperm.xlu1 %2366, %v2673_v21   ;;  %320 = vperm.xlu0 %2365, %v2676_v22  }
  0x2f   : > { %329 = vperm.xlu1 %2366, %v2681_v23   ;;  %326 = vperm.xlu0 %2365, %v2684_v24  }
  0x33   : > { %2367 = vset.pattern.permute.xlu1 %v2506_v26  ;;  %236 = vperm.xlu0 %2365, %v201_v25  }
  0x34   : > { %428 = vperm.xlu1 %2367, %v201_v25  }
  0x37   : > { %239 = vperm.xlu0 %2365, %v202_v27  }
  0x38   : > { %431 = vperm.xlu1 %2367, %v202_v27  }
  0x3b   : > { %242 = vperm.xlu0 %2365, %v203_v28  }
  0x3c   : > { %434 = vperm.xlu1 %2367, %v203_v28  }
  0x3f   : > { %245 = vperm.xlu0 %2365, %v204_v29  }
  0x40   : > { %437 = vperm.xlu1 %2367, %v204_v29  }
  0x43   : > { %248 = vperm.xlu0 %2365, %v205_v30  }
  0x44   : > { %440 = vperm.xlu1 %2367, %v205_v30  }
  0x47   : > { %251 = vperm.xlu0 %2365, %v206_v31  }
  0x48   : > { %443 = vperm.xlu1 %2367, %v206_v31  }
  0x4b   : > { %254 = vperm.xlu0 %2365, %v207_v32  }
  0x4c   : > { %446 = vperm.xlu1 %2367, %v207_v32  }
  0x4f   : > { %257 = vperm.xlu0 %2365, %v208_v33  }
  0x50   : > { %449 = vperm.xlu1 %2367, %v208_v33  }
  0x53   : > { %260 = vperm.xlu0 %2365, %v209_v34  }
  0x54   : > { %452 = vperm.xlu1 %2367, %v209_v34  }
  0x57   : > { %263 = vperm.xlu0 %2365, %v210_v35  }
  0x58   : > { %455 = vperm.xlu1 %2367, %v210_v35  }
  0x5b   : > { %266 = vperm.xlu0 %2365, %v211_v36  }
  0x5c   : > { %458 = vperm.xlu1 %2367, %v211_v36  }
  0x5f   : > { %269 = vperm.xlu0 %2365, %v212_v37  }
  0x60   : > { %461 = vperm.xlu1 %2367, %v212_v37  }
  0x63   : > { %272 = vperm.xlu0 %2365, %v213_v38  }
  0x64   : > { %464 = vperm.xlu1 %2367, %v213_v38  }
  0x67   : > { %275 = vperm.xlu0 %2365, %v214_v39  }
  0x68   : > { %467 = vperm.xlu1 %2367, %v214_v39  }
  0x6b   : > { %278 = vperm.xlu0 %2365, %v215_v40  }
  0x6c   : > { %470 = vperm.xlu1 %2367, %v215_v40  }
  0x6f   : > { %281 = vperm.xlu0 %2365, %v216_v41  }
  0x70   : > { %473 = vperm.xlu1 %2367, %v216_v41  }
  0x73   : > { %2368 = vset.pattern.permute.xlu0 %v2506_v26 }
  0x74   : > { %479 = vperm.xlu1 %2367, %v2600_v9   ;;  %476 = vperm.xlu0 %2368, %v2585_v6  }
  0x78   : > { %482 = vperm.xlu1 %2367, %v2582_v5   ;;  %485 = vperm.xlu0 %2368, %v2597_v8  }
  0x7c   : > { %488 = vperm.xlu1 %2367, %v2619_v12   ;;  %491 = vperm.xlu0 %2368, %v2616_v11  }
  0x80   : > { %494 = vperm.xlu1 %2367, %v2638_v15   ;;  %497 = vperm.xlu0 %2368, %v2635_v14  }
  0x84   : > { %500 = vperm.xlu1 %2367, %v2657_v18   ;;  %503 = vperm.xlu0 %2368, %v2654_v17  }
  0x88   : > { %506 = vperm.xlu1 %2367, %v2668_v20   ;;  %509 = vperm.xlu0 %2368, %v2665_v19  }
  0x8c   : > { %512 = vperm.xlu1 %2367, %v2676_v22   ;;  %515 = vperm.xlu0 %2368, %v2673_v21  }
  0x8e   : > { %v291_v44 = vpop.permute.xlu1 %290  ;;  %v285_v45 = vpop.permute.xlu0 %284 }
  0x8f   : > { %vm347_vm1 = vcmp.eq.s32.totalorder %v2716_v43, %v285_v45  ;;  %vm349_vm2 = vcmp.eq.s32.totalorder %v2716_v43, %v291_v44 }
  0x90   : > { %518 = vperm.xlu1 %2367, %v2684_v24   ;;  %521 = vperm.xlu0 %2368, %v2681_v23   ;;  %v1855_v47 = vsel %vm347_vm1, 1.0, %v2507_v46  ;;  %v1857_v51 = vsel %vm349_vm2, 1.0, %v2507_v46 }
  0x91   : > { %2170 = vmatprep.mubr.msk.f32.mxu1 %vm627_vm0, %v1855_v47 }
  0x92   : > { %v294_v48 = vpop.permute.xlu1 %293  ;;  %v288_v49 = vpop.permute.xlu0 %287 }
  0x93   : > { %vm348_vm3 = vcmp.eq.s32.totalorder %v2716_v43, %v288_v49  ;;  %vm350_vm4 = vcmp.eq.s32.totalorder %v2716_v43, %v294_v48 }
  0x94   : > { %v1856_v50 = vsel %vm348_vm3, 1.0, %v2507_v46  ;;  %v1858_v54 = vsel %vm350_vm4, 1.0, %v2507_v46 }
  0x95   : > { %2171 = vmatmul.mubr.msk.f32.vlgmr.msra.gmra.mxu1 %vm627_vm0, %v1856_v50 }
  0x96   : > { %v300_v52 = vpop.permute.xlu1 %299  ;;  %2173 = vmatprep.mubr.msk.f32.mxu1 %vm627_vm0, %v1857_v51  ;;  %v297_v53 = vpop.permute.xlu0 %296  ;;  %2195 = vmatpush3.msra.mxu1 %v2544_v0 }
  0x97   : > { %vm351_vm5 = vcmp.eq.s32.totalorder %v2716_v43, %v297_v53  ;;  %2196 = vmatprep.subr.mxu1 %v2549_v2  ;;  %vm352_vm6 = vcmp.eq.s32.totalorder %v2716_v43, %v300_v52 }
  0x98   : > { %v1859_v55 = vsel %vm351_vm5, 1.0, %v2507_v46  ;;  %2197 = vmatpush3.msra.mxu1 %v2549_v2  ;;  %v1860_v58 = vsel %vm352_vm6, 1.0, %v2507_v46 }
  0x99   : > { %2174 = vmatmul.mubr.msk.f32.gmra.mxu1 %vm627_vm0, %v1858_v54  ;;  %2198 = vmatprep.subr.mxu1 %v2559_v3 }
  0x9a   : > { %v306_v56 = vpop.permute.xlu1 %305  ;;  %2176 = vmatprep.mubr.msk.f32.mxu1 %vm627_vm0, %v1859_v55  ;;  %v303_v57 = vpop.permute.xlu0 %302  ;;  %2199 = vmatpush3.msra.mxu1 %v2559_v3 }
  0x9b   : > { %vm353_vm7 = vcmp.eq.s32.totalorder %v2716_v43, %v303_v57  ;;  %2200 = vmatprep.subr.mxu1 %v2578_v4  ;;  %vm354_vm8 = vcmp.eq.s32.totalorder %v2716_v43, %v306_v56 }
  0x9c   : > { %v1861_v59 = vsel %vm353_vm7, 1.0, %v2507_v46  ;;  %2201 = vmatpush3.msra.mxu1 %v2578_v4  ;;  %v1862_v62 = vsel %vm354_vm8, 1.0, %v2507_v46 }
  0x9d   : > { %2177 = vmatmul.mubr.msk.f32.gmra.mxu1 %vm627_vm0, %v1860_v58  ;;  %2202 = vmatprep.subr.mxu1 %v2594_v7 }
  0x9e   : > { %v312_v60 = vpop.permute.xlu1 %311  ;;  %2179 = vmatprep.mubr.msk.f32.mxu1 %vm627_vm0, %v1861_v59  ;;  %v309_v61 = vpop.permute.xlu0 %308  ;;  %2203 = vmatpush3.msra.mxu1 %v2594_v7 }
  0x9f   : > { %vm355_vm9 = vcmp.eq.s32.totalorder %v2716_v43, %v309_v61  ;;  %2204 = vmatprep.subr.mxu1 %v2610_v10  ;;  %vm356_vm10 = vcmp.eq.s32.totalorder %v2716_v43, %v312_v60  ;;  %v1317_v61 = vld [vmem:[%s3106_s2 + $0x78] sm:$0xff] }
  0xa0   : > { %v1863_v63 = vsel %vm355_vm9, 1.0, %v2507_v46  ;;  %2205 = vmatpush3.msra.mxu1 %v2610_v10  ;;  %v1864_v2 = vsel %vm356_vm10, 1.0, %v2507_v46  ;;  %2258 = vmatprep.subr.mxu0 %v1317_v61 }
  0xa1   : > { %2180 = vmatmul.mubr.msk.f32.gmra.mxu1 %vm627_vm0, %v1862_v62  ;;  %2206 = vmatprep.subr.mxu1 %v2627_v13 }
  0xa2   : > { %v318_v0 = vpop.permute.xlu1 %317  ;;  %2182 = vmatprep.mubr.msk.f32.mxu1 %vm627_vm0, %v1863_v63  ;;  %v315_v1 = vpop.permute.xlu0 %314  ;;  %2207 = vmatpush3.msra.mxu1 %v2627_v13 }
  0xa3   : > { %vm357_vm11 = vcmp.eq.s32.totalorder %v2716_v43, %v315_v1  ;;  %2208 = vmatprep.subr.mxu1 %v2644_v16  ;;  %vm358_vm12 = vcmp.eq.s32.totalorder %v2716_v43, %v318_v0  ;;  %v1316_v0 = vld [vmem:[%s3106_s2 + $0x70] sm:$0xff] }
  0xa4   : > { %v1865_v3 = vsel %vm357_vm11, 1.0, %v2507_v46  ;;  %2209 = vmatpush3.msra.mxu1 %v2644_v16  ;;  %v1866_v6 = vsel %vm358_vm12, 1.0, %v2507_v46 }
  0xa5   : > { %2183 = vmatmul.mubr.msk.f32.gmra.mxu1 %vm627_vm0, %v1864_v2 }
  0xa6   : > { %v324_v4 = vpop.permute.xlu1 %323  ;;  %2185 = vmatprep.mubr.msk.f32.mxu1 %vm627_vm0, %v1865_v3  ;;  %v321_v5 = vpop.permute.xlu0 %320  ;;  %v1315_v3 = vld [vmem:[%s3106_s2 + $0x68] sm:$0xff] }
  0xa7   : > { %vm359_vm13 = vcmp.eq.s32.totalorder %v2716_v43, %v321_v5  ;;  %vm360_vm14 = vcmp.eq.s32.totalorder %v2716_v43, %v324_v4 }
  0xa8   : > { %v1867_v7 = vsel %vm359_vm13, 1.0, %v2507_v46  ;;  %v1868_v10 = vsel %vm360_vm14, 1.0, %v2507_v46 }
  0xa9   : > { %2186 = vmatmul.mubr.msk.f32.gmra.mxu1 %vm627_vm0, %v1866_v6  ;;  %v1314_v6 = vld [vmem:[%s3106_s2 + $0x60] sm:$0xff] }
  0xaa   : > { %v330_v8 = vpop.permute.xlu1 %329  ;;  %2188 = vmatprep.mubr.msk.f32.mxu1 %vm627_vm0, %v1867_v7  ;;  %v327_v9 = vpop.permute.xlu0 %326 }
  0xab   : > { %vm361_vm15 = vcmp.eq.s32.totalorder %v2716_v43, %v327_v9  ;;  %vm362_vm1 = vcmp.eq.s32.totalorder %v2716_v43, %v330_v8  ;;  %v1313_v9 = vld [vmem:[%s3106_s2 + $0x58] sm:$0xff] }
  0xac   : > { %v1869_v11 = vsel %vm361_vm15, 1.0, %v2507_v46  ;;  %v1870_v14 = vsel %vm362_vm1, 1.0, %v2507_v46 }
  0xad   : > { %2189 = vmatmul.mubr.msk.f32.gmra.mxu1 %vm627_vm0, %v1868_v10 }
  0xae   : > { %2191 = vmatprep.mubr.msk.f32.mxu1 %vm627_vm0, %v1869_v11  ;;  %v237_v12 = vpop.permute.xlu0 %236 }
  0xaf   : > { %vm331_vm2 = vcmp.eq.s32.totalorder %v2716_v43, %v237_v12  ;;  %v429_v13 = vpop.permute.xlu1 %428  ;;  %v1312_v12 = vld [vmem:[%s3106_s2 + $0x50] sm:$0xff] }
  0xb0   : > { %vm523_vm3 = vcmp.eq.s32.totalorder %v2716_v43, %v429_v13  ;;  %v1839_v15 = vsel %vm331_vm2, 1.0, %v2507_v46 }
  0xb1   : > { %v1871_v16 = vsel %vm523_vm3, 1.0, %v2507_v46  ;;  %2146 = vmatprep.mubr.msk.f32.mxu0 %vm627_vm0, %v1839_v15  ;;  %2192 = vmatmul.mubr.msk.f32.gmra.mxu1 %vm627_vm0, %v1870_v14  ;;  %v1311_v15 = vld [vmem:[%s3106_s2 + $0x48] sm:$0xff] }
  0xb2   : > { %2210 = vmatprep.mubr.msk.f32.mxu1 %vm627_vm0, %v1871_v16  ;;  %v240_v17 = vpop.permute.xlu0 %239 }
  0xb3   : > { %vm332_vm4 = vcmp.eq.s32.totalorder %v2716_v43, %v240_v17  ;;  %v432_v18 = vpop.permute.xlu1 %431 }
  0xb4   : > { %v1840_v19 = vsel %vm332_vm4, 1.0, %v2507_v46  ;;  %vm524_vm5 = vcmp.eq.s32.totalorder %v2716_v43, %v432_v18  ;;  %v1310_v18 = vld [vmem:[%s3106_s2 + $0x40] sm:$0xff] }
  0xb5   : > { %v1872_v20 = vsel %vm524_vm5, 1.0, %v2507_v46  ;;  %2147 = vmatmul.mubr.msk.f32.vlgmr.msra.gmra.mxu0 %vm627_vm0, %v1840_v19 }
  0xb6   : > { %2211 = vmatmul.mubr.msk.f32.vlgmr.msra.gmra.mxu1 %vm627_vm0, %v1872_v20  ;;  %v243_v21 = vpop.permute.xlu0 %242  ;;  %2259 = vmatpush3.msra.mxu0 %v1317_v61 }
  0xb7   : > { %vm333_vm6 = vcmp.eq.s32.totalorder %v2716_v43, %v243_v21  ;;  %v435_v22 = vpop.permute.xlu1 %434  ;;  %2260 = vmatprep.subr.mxu0 %v1316_v0  ;;  %v1309_v21 = vld [vmem:[%s3106_s2 + $0x38] sm:$0xff] }
  0xb8   : > { %v1841_v23 = vsel %vm333_vm6, 1.0, %v2507_v46  ;;  %vm525_vm7 = vcmp.eq.s32.totalorder %v2716_v43, %v435_v22  ;;  %2261 = vmatpush3.msra.mxu0 %v1316_v0 }
  0xb9   : > { %v1873_v24 = vsel %vm525_vm7, 1.0, %v2507_v46  ;;  %2149 = vmatprep.mubr.msk.f32.mxu0 %vm627_vm0, %v1841_v23  ;;  %2262 = vmatprep.subr.mxu0 %v1315_v3 }
  0xba   : > { %2213 = vmatprep.mubr.msk.f32.mxu1 %vm627_vm0, %v1873_v24  ;;  %v246_v25 = vpop.permute.xlu0 %245  ;;  %2263 = vmatpush3.msra.mxu0 %v1315_v3  ;;  %v1308_v24 = vld [vmem:[%s3106_s2 + $0x30] sm:$0xff] }
  0xbb   : > { %vm334_vm8 = vcmp.eq.s32.totalorder %v2716_v43, %v246_v25  ;;  %v438_v26 = vpop.permute.xlu1 %437  ;;  %2264 = vmatprep.subr.mxu0 %v1314_v6 }
  0xbc   : > { %v1842_v27 = vsel %vm334_vm8, 1.0, %v2507_v46  ;;  %vm526_vm9 = vcmp.eq.s32.totalorder %v2716_v43, %v438_v26  ;;  %2265 = vmatpush3.msra.mxu0 %v1314_v6 }
  0xbd   : > { %v1874_v28 = vsel %vm526_vm9, 1.0, %v2507_v46  ;;  %2150 = vmatmul.mubr.msk.f32.gmra.mxu0 %vm627_vm0, %v1842_v27  ;;  %2266 = vmatprep.subr.mxu0 %v1313_v9  ;;  %v1307_v27 = vld [vmem:[%s3106_s2 + $0x28] sm:$0xff] }
  0xbe   : > { %2214 = vmatmul.mubr.msk.f32.gmra.mxu1 %vm627_vm0, %v1874_v28  ;;  %v249_v29 = vpop.permute.xlu0 %248  ;;  %2267 = vmatpush3.msra.mxu0 %v1313_v9 }
  0xbf   : > { %vm335_vm10 = vcmp.eq.s32.totalorder %v2716_v43, %v249_v29  ;;  %v441_v30 = vpop.permute.xlu1 %440  ;;  %2268 = vmatprep.subr.mxu0 %v1312_v12 }
  0xc0   : > { %v1843_v31 = vsel %vm335_vm10, 1.0, %v2507_v46  ;;  %vm527_vm11 = vcmp.eq.s32.totalorder %v2716_v43, %v441_v30  ;;  %2269 = vmatpush3.msra.mxu0 %v1312_v12  ;;  %v1306_v30 = vld [vmem:[%s3106_s2 + $0x20] sm:$0xff] }
  0xc1   : > { %v1875_v32 = vsel %vm527_vm11, 1.0, %v2507_v46  ;;  %2152 = vmatprep.mubr.msk.f32.mxu0 %vm627_vm0, %v1843_v31  ;;  %2270 = vmatprep.subr.mxu0 %v1311_v15 }
  0xc2   : > { %2216 = vmatprep.mubr.msk.f32.mxu1 %vm627_vm0, %v1875_v32  ;;  %v252_v33 = vpop.permute.xlu0 %251  ;;  %2271 = vmatpush3.msra.mxu0 %v1311_v15 }
  0xc3   : > { %vm336_vm12 = vcmp.eq.s32.totalorder %v2716_v43, %v252_v33  ;;  %v444_v34 = vpop.permute.xlu1 %443  ;;  %2272 = vmatprep.subr.mxu0 %v1310_v18  ;;  %v1305_v33 = vld [vmem:[%s3106_s2 + $0x18] sm:$0xff] }
  0xc4   : > { %v1844_v35 = vsel %vm336_vm12, 1.0, %v2507_v46  ;;  %vm528_vm13 = vcmp.eq.s32.totalorder %v2716_v43, %v444_v34  ;;  %2273 = vmatpush3.msra.mxu0 %v1310_v18 }
  0xc5   : > { %v1876_v36 = vsel %vm528_vm13, 1.0, %v2507_v46  ;;  %2153 = vmatmul.mubr.msk.f32.gmra.mxu0 %vm627_vm0, %v1844_v35  ;;  %2274 = vmatprep.subr.mxu0 %v1309_v21 }
  0xc6   : > { %2217 = vmatmul.mubr.msk.f32.gmra.mxu1 %vm627_vm0, %v1876_v36  ;;  %v255_v37 = vpop.permute.xlu0 %254  ;;  %2275 = vmatpush3.msra.mxu0 %v1309_v21  ;;  %v1304_v36 = vld [vmem:[%s3106_s2 + $0x10] sm:$0xff] }
  0xc7   : > { %vm337_vm14 = vcmp.eq.s32.totalorder %v2716_v43, %v255_v37  ;;  %v447_v38 = vpop.permute.xlu1 %446  ;;  %2276 = vmatprep.subr.mxu0 %v1308_v24 }
  0xc8   : > { %v1845_v39 = vsel %vm337_vm14, 1.0, %v2507_v46  ;;  %vm529_vm15 = vcmp.eq.s32.totalorder %v2716_v43, %v447_v38  ;;  %2277 = vmatpush3.msra.mxu0 %v1308_v24 }
  0xc9   : > { %v1877_v40 = vsel %vm529_vm15, 1.0, %v2507_v46  ;;  %2155 = vmatprep.mubr.msk.f32.mxu0 %vm627_vm0, %v1845_v39  ;;  %2278 = vmatprep.subr.mxu0 %v1307_v27  ;;  %v1303_v39 = vld [vmem:[%s3106_s2 + $0x8] sm:$0xff] }
  0xca   : > { %2219 = vmatprep.mubr.msk.f32.mxu1 %vm627_vm0, %v1877_v40  ;;  %v258_v41 = vpop.permute.xlu0 %257  ;;  %2279 = vmatpush3.msra.mxu0 %v1307_v27 }
  0xcb   : > { %vm338_vm1 = vcmp.eq.s32.totalorder %v2716_v43, %v258_v41  ;;  %v450_v42 = vpop.permute.xlu1 %449  ;;  %2280 = vmatprep.subr.mxu0 %v1306_v30 }
  0xcc   : > { %v1846_v44 = vsel %vm338_vm1, 1.0, %v2507_v46  ;;  %vm530_vm2 = vcmp.eq.s32.totalorder %v2716_v43, %v450_v42  ;;  %2281 = vmatpush3.msra.mxu0 %v1306_v30  ;;  %v1302_v42 = vld [vmem:[%s3106_s2] sm:$0xff] }
  0xcd   : > { %v1878_v45 = vsel %vm530_vm2, 1.0, %v2507_v46  ;;  %2156 = vmatmul.mubr.msk.f32.gmra.mxu0 %vm627_vm0, %v1846_v44  ;;  %2282 = vmatprep.subr.mxu0 %v1305_v33 }
  0xce   : > { %2220 = vmatmul.mubr.msk.f32.gmra.mxu1 %vm627_vm0, %v1878_v45  ;;  %v261_v47 = vpop.permute.xlu0 %260  ;;  %2283 = vmatpush3.msra.mxu0 %v1305_v33 }
  0xcf   : > { %vm339_vm3 = vcmp.eq.s32.totalorder %v2716_v43, %v261_v47  ;;  %v453_v48 = vpop.permute.xlu1 %452  ;;  %2284 = vmatprep.subr.mxu0 %v1304_v36 }
  0xd0   : > { %v1847_v49 = vsel %vm339_vm3, 1.0, %v2507_v46  ;;  %vm531_vm4 = vcmp.eq.s32.totalorder %v2716_v43, %v453_v48  ;;  %2285 = vmatpush3.msra.mxu0 %v1304_v36 }
  0xd1   : > { %v1879_v50 = vsel %vm531_vm4, 1.0, %v2507_v46  ;;  %2158 = vmatprep.mubr.msk.f32.mxu0 %vm627_vm0, %v1847_v49  ;;  %2286 = vmatprep.subr.mxu0 %v1303_v39 }
  0xd2   : > { %2222 = vmatprep.mubr.msk.f32.mxu1 %vm627_vm0, %v1879_v50  ;;  %v264_v51 = vpop.permute.xlu0 %263  ;;  %2287 = vmatpush3.msra.mxu0 %v1303_v39 }
  0xd3   : > { %vm340_vm5 = vcmp.eq.s32.totalorder %v2716_v43, %v264_v51  ;;  %v456_v52 = vpop.permute.xlu1 %455  ;;  %2288 = vmatprep.subr.mxu0 %v1302_v42 }
  0xd4   : > { %v1848_v53 = vsel %vm340_vm5, 1.0, %v2507_v46  ;;  %vm532_vm6 = vcmp.eq.s32.totalorder %v2716_v43, %v456_v52  ;;  %2289 = vmatpush3.msra.mxu0 %v1302_v42 }
  0xd5   : > { %v1880_v54 = vsel %vm532_vm6, 1.0, %v2507_v46  ;;  %2159 = vmatmul.mubr.msk.f32.gmra.mxu0 %vm627_vm0, %v1848_v53 }
  0xd6   : > { %2223 = vmatmul.mubr.msk.f32.gmra.mxu1 %vm627_vm0, %v1880_v54  ;;  %v267_v55 = vpop.permute.xlu0 %266 }
  0xd7   : > { %vm341_vm7 = vcmp.eq.s32.totalorder %v2716_v43, %v267_v55  ;;  %v459_v56 = vpop.permute.xlu1 %458 }
  0xd8   : > { %v1849_v57 = vsel %vm341_vm7, 1.0, %v2507_v46  ;;  %vm533_vm8 = vcmp.eq.s32.totalorder %v2716_v43, %v459_v56 }
  0xd9   : > { %v1881_v58 = vsel %vm533_vm8, 1.0, %v2507_v46  ;;  %2161 = vmatprep.mubr.msk.f32.mxu0 %vm627_vm0, %v1849_v57 }
  0xda   : > { %2225 = vmatprep.mubr.msk.f32.mxu1 %vm627_vm0, %v1881_v58  ;;  %v270_v59 = vpop.permute.xlu0 %269 }
  0xdb   : > { %vm342_vm9 = vcmp.eq.s32.totalorder %v2716_v43, %v270_v59  ;;  %v462_v60 = vpop.permute.xlu1 %461 }
  0xdc   : > { %v1850_v62 = vsel %vm342_vm9, 1.0, %v2507_v46  ;;  %vm534_vm10 = vcmp.eq.s32.totalorder %v2716_v43, %v462_v60 }
  0xdd   : > { %v1882_v63 = vsel %vm534_vm10, 1.0, %v2507_v46  ;;  %2162 = vmatmul.mubr.msk.f32.gmra.mxu0 %vm627_vm0, %v1850_v62 }
  0xde   : > { %2226 = vmatmul.mubr.msk.f32.gmra.mxu1 %vm627_vm0, %v1882_v63  ;;  %v273_v1 = vpop.permute.xlu0 %272 }
  0xdf   : > { %vm343_vm11 = vcmp.eq.s32.totalorder %v2716_v43, %v273_v1  ;;  %v465_v2 = vpop.permute.xlu1 %464 }
  0xe0   : > { %v1851_v4 = vsel %vm343_vm11, 1.0, %v2507_v46  ;;  %vm535_vm12 = vcmp.eq.s32.totalorder %v2716_v43, %v465_v2 }
  0xe1   : > { %v1883_v5 = vsel %vm535_vm12, 1.0, %v2507_v46  ;;  %2164 = vmatprep.mubr.msk.f32.mxu0 %vm627_vm0, %v1851_v4 }
  0xe2   : > { %2228 = vmatprep.mubr.msk.f32.mxu1 %vm627_vm0, %v1883_v5  ;;  %v276_v7 = vpop.permute.xlu0 %275 }
  0xe3   : > { %vm344_vm13 = vcmp.eq.s32.totalorder %v2716_v43, %v276_v7  ;;  %v468_v8 = vpop.permute.xlu1 %467 }
  0xe4   : > { %v1852_v10 = vsel %vm344_vm13, 1.0, %v2507_v46  ;;  %vm536_vm14 = vcmp.eq.s32.totalorder %v2716_v43, %v468_v8 }
  0xe5   : > { %v1884_v11 = vsel %vm536_vm14, 1.0, %v2507_v46  ;;  %2165 = vmatmul.mubr.msk.f32.gmra.mxu0 %vm627_vm0, %v1852_v10 }
  0xe6   : > { %2229 = vmatmul.mubr.msk.f32.gmra.mxu1 %vm627_vm0, %v1884_v11  ;;  %v279_v13 = vpop.permute.xlu0 %278 }
  0xe7   : > { %vm345_vm15 = vcmp.eq.s32.totalorder %v2716_v43, %v279_v13  ;;  %v471_v14 = vpop.permute.xlu1 %470 }
  0xe8   : > { %v1853_v16 = vsel %vm345_vm15, 1.0, %v2507_v46  ;;  %vm537_vm1 = vcmp.eq.s32.totalorder %v2716_v43, %v471_v14 }
  0xe9   : > { %v1885_v17 = vsel %vm537_vm1, 1.0, %v2507_v46  ;;  %2167 = vmatprep.mubr.msk.f32.mxu0 %vm627_vm0, %v1853_v16 }
  0xea   : > { %2231 = vmatprep.mubr.msk.f32.mxu1 %vm627_vm0, %v1885_v17  ;;  %v282_v19 = vpop.permute.xlu0 %281 }
  0xeb   : > { %vm346_vm2 = vcmp.eq.s32.totalorder %v2716_v43, %v282_v19  ;;  %v474_v20 = vpop.permute.xlu1 %473 }
  0xec   : > { %v1854_v22 = vsel %vm346_vm2, 1.0, %v2507_v46  ;;  %vm538_vm3 = vcmp.eq.s32.totalorder %v2716_v43, %v474_v20 }
  0xed   : > { %v1886_v23 = vsel %vm538_vm3, 1.0, %v2507_v46  ;;  %2168 = vmatmul.mubr.msk.f32.gmra.mxu0 %vm627_vm0, %v1854_v22 }
  0xee   : > { %2232 = vmatmul.mubr.msk.f32.gmra.mxu1 %vm627_vm0, %v1886_v23 }
  0xef   : > { %v480_v25 = vpop.permute.xlu1 %479  ;;  %v477_v26 = vpop.permute.xlu0 %476 }
  0xf0   : > { %vm540_vm4 = vcmp.eq.s32.totalorder %v2716_v43, %v480_v25  ;;  %vm539_vm5 = vcmp.eq.s32.totalorder %v2716_v43, %v477_v26 }
  0xf1   : > { %v1888_v28 = vsel %vm540_vm4, 1.0, %v2507_v46  ;;  %v1887_v29 = vsel %vm539_vm5, 1.0, %v2507_v46 }
  0xf2   : > { %2234 = vmatprep.mubr.msk.f32.mxu1 %vm627_vm0, %v1887_v29 }
  0xf3   : > { %v483_v31 = vpop.permute.xlu1 %482  ;;  %2235 = vmatmul.mubr.msk.f32.gmra.mxu1 %vm627_vm0, %v1888_v28  ;;  %v486_v32 = vpop.permute.xlu0 %485 }
  0xf4   : > { %vm541_vm6 = vcmp.eq.s32.totalorder %v2716_v43, %v483_v31  ;;  %vm542_vm7 = vcmp.eq.s32.totalorder %v2716_v43, %v486_v32 }
  0xf5   : > { %v1889_v34 = vsel %vm541_vm6, 1.0, %v2507_v46  ;;  %v1890_v35 = vsel %vm542_vm7, 1.0, %v2507_v46 }
  0xf6   : > { %2237 = vmatprep.mubr.msk.f32.mxu1 %vm627_vm0, %v1889_v34 }
  0xf7   : > { %v489_v37 = vpop.permute.xlu1 %488  ;;  %2238 = vmatmul.mubr.msk.f32.gmra.mxu1 %vm627_vm0, %v1890_v35  ;;  %v492_v38 = vpop.permute.xlu0 %491 }
  0xf8   : > { %vm543_vm8 = vcmp.eq.s32.totalorder %v2716_v43, %v489_v37  ;;  %vm544_vm9 = vcmp.eq.s32.totalorder %v2716_v43, %v492_v38 }
  0xf9   : > { %v1891_v40 = vsel %vm543_vm8, 1.0, %v2507_v46  ;;  %v1892_v41 = vsel %vm544_vm9, 1.0, %v2507_v46 }
  0xfa   : > { %2240 = vmatprep.mubr.msk.f32.mxu1 %vm627_vm0, %v1891_v40 }
  0xfb   : > { %v495_v44 = vpop.permute.xlu1 %494  ;;  %2241 = vmatmul.mubr.msk.f32.gmra.mxu1 %vm627_vm0, %v1892_v41  ;;  %v498_v45 = vpop.permute.xlu0 %497 }
  0xfc   : > { %vm545_vm10 = vcmp.eq.s32.totalorder %v2716_v43, %v495_v44  ;;  %vm546_vm11 = vcmp.eq.s32.totalorder %v2716_v43, %v498_v45 }
  0xfd   : > { %v1893_v47 = vsel %vm545_vm10, 1.0, %v2507_v46  ;;  %v1894_v48 = vsel %vm546_vm11, 1.0, %v2507_v46 }
  0xfe   : > { %2243 = vmatprep.mubr.msk.f32.mxu1 %vm627_vm0, %v1893_v47 }
  0xff   : > { %v501_v49 = vpop.permute.xlu1 %500  ;;  %2244 = vmatmul.mubr.msk.f32.gmra.mxu1 %vm627_vm0, %v1894_v48  ;;  %v504_v50 = vpop.permute.xlu0 %503 }
 0x100   : > { %vm547_vm12 = vcmp.eq.s32.totalorder %v2716_v43, %v501_v49  ;;  %vm548_vm13 = vcmp.eq.s32.totalorder %v2716_v43, %v504_v50 }
 0x101   : > { %v1895_v51 = vsel %vm547_vm12, 1.0, %v2507_v46  ;;  %v1896_v52 = vsel %vm548_vm13, 1.0, %v2507_v46 }
 0x102   : > { %2246 = vmatprep.mubr.msk.f32.mxu1 %vm627_vm0, %v1895_v51 }
 0x103   : > { %v507_v53 = vpop.permute.xlu1 %506  ;;  %2247 = vmatmul.mubr.msk.f32.gmra.mxu1 %vm627_vm0, %v1896_v52  ;;  %v510_v54 = vpop.permute.xlu0 %509 }
 0x104   : > { %vm549_vm14 = vcmp.eq.s32.totalorder %v2716_v43, %v507_v53  ;;  %vm550_vm15 = vcmp.eq.s32.totalorder %v2716_v43, %v510_v54 }
 0x105   : > { %v1897_v55 = vsel %vm549_vm14, 1.0, %v2507_v46  ;;  %v1898_v56 = vsel %vm550_vm15, 1.0, %v2507_v46 }
 0x106   : > { %2249 = vmatprep.mubr.msk.f32.mxu1 %vm627_vm0, %v1897_v55 }
 0x107   : > { %v513_v57 = vpop.permute.xlu1 %512  ;;  %2250 = vmatmul.mubr.msk.f32.gmra.mxu1 %vm627_vm0, %v1898_v56  ;;  %v516_v58 = vpop.permute.xlu0 %515 }
 0x108   : > { %vm551_vm1 = vcmp.eq.s32.totalorder %v2716_v43, %v513_v57  ;;  %vm552_vm2 = vcmp.eq.s32.totalorder %v2716_v43, %v516_v58 }
 0x109   : > { %v1899_v59 = vsel %vm551_vm1, 1.0, %v2507_v46  ;;  %v1900_v60 = vsel %vm552_vm2, 1.0, %v2507_v46 }
 0x10a   : > { %2252 = vmatprep.mubr.msk.f32.mxu1 %vm627_vm0, %v1899_v59 }
 0x10b   : > { %v519_v61 = vpop.permute.xlu1 %518  ;;  %2253 = vmatmul.mubr.msk.f32.gmra.mxu1 %vm627_vm0, %v1900_v60  ;;  %v522_v62 = vpop.permute.xlu0 %521 }
 0x10c   : > { %vm553_vm3 = vcmp.eq.s32.totalorder %v2716_v43, %v519_v61  ;;  %vm554_vm4 = vcmp.eq.s32.totalorder %v2716_v43, %v522_v62 }
 0x10d   : > { %v1901_v63 = vsel %vm553_vm3, 1.0, %v2507_v46  ;;  %v1902_v0 = vsel %vm554_vm4, 1.0, %v2507_v46 }
 0x10e   : > { %2255 = vmatprep.mubr.msk.f32.mxu1 %vm627_vm0, %v1901_v63 }
 0x10f   : > { %2256 = vmatmul.mubr.msk.f32.gmra.mxu1 %vm627_vm0, %v1902_v0 }
 0x155   : > { %v2977_v1 = vpop.f32.mrf.mxu1 }
 0x157   : > { %v2979_v2 = vpop.f32.mrf.mxu1 }
 0x159   : > { %v2981_v3 = vpop.f32.mrf.mxu1 }
 0x15b   : > { %v2983_v4 = vpop.f32.mrf.mxu1 }
 0x15d   : > { %v2985_v5 = vpop.f32.mrf.mxu1 }
 0x15f   : > { %v2987_v6 = vpop.f32.mrf.mxu1 }
 0x161   : > { %v2989_v43 = vpop.f32.mrf.mxu1 }
 0x163   : > { %v2991_v7 = vpop.f32.mrf.mxu1 }
 0x165   : > { %v2993_v46 = vpop.f32.mrf.mxu1 }
 0x167   : > { %v2995_v8 = vpop.f32.mrf.mxu1 }
 0x169   : > { %v2997_v9 = vpop.f32.mrf.mxu1 }
 0x16b   : > { %v2999_v10 = vpop.f32.mrf.mxu1 }
 0x16d   : > { %v3001_v11 = vpop.f32.mrf.mxu1 }
 0x16f   : > { %v3003_v12 = vpop.f32.mrf.mxu1 }
 0x171   : > { %v3005_v13 = vpop.f32.mrf.mxu1 }
 0x173   : > { %v3007_v14 = vpop.f32.mrf.mxu1 }
 0x175   : > { %v2148_v15 = vpop.f32.mrf.mxu0 }
 0x176   : > { %v2212_v16 = vpop.f32.mrf.mxu1 }
 0x177   : > { %v790_v17 = vpop.f32.mrf.mxu0  ;;  %v1271_v20 = vmul.f32 %v2212_v16, %v2148_v15 }
 0x178   : > { %v1111_v18 = vpop.f32.mrf.mxu1 }
 0x179   : > { %v1270_v19 = vmul.f32 %v1111_v18, %v790_v17 }
 0x17b   : > { %2290 = vmatprep.mubr.f32.mxu0 %v1270_v19 }
 0x17c   : > { %2291 = vmatmul.mubr.f32.vlgmr.msra.gmra.mxu0 %v1271_v20 }
 0x17d   : > { %v2151_v21 = vpop.f32.mrf.mxu0 }
 0x17e   : > { %v2215_v22 = vpop.f32.mrf.mxu1 }
 0x17f   : > { %v800_v23 = vpop.f32.mrf.mxu0  ;;  %v1273_v26 = vmul.f32 %v2215_v22, %v2151_v21 }
 0x180   : > { %v1121_v24 = vpop.f32.mrf.mxu1 }
 0x181   : > { %v1272_v25 = vmul.f32 %v1121_v24, %v800_v23 }
 0x183   : > { %2293 = vmatprep.mubr.f32.mxu0 %v1272_v25 }
 0x184   : > { %2294 = vmatmul.mubr.f32.gmra.mxu0 %v1273_v26 }
 0x185   : > { %v2154_v27 = vpop.f32.mrf.mxu0 }
 0x186   : > { %v2218_v28 = vpop.f32.mrf.mxu1 }
 0x187   : > { %v810_v29 = vpop.f32.mrf.mxu0  ;;  %v1275_v32 = vmul.f32 %v2218_v28, %v2154_v27 }
 0x188   : > { %v1131_v30 = vpop.f32.mrf.mxu1 }
 0x189   : > { %v1274_v31 = vmul.f32 %v1131_v30, %v810_v29 }
 0x18b   : > { %2296 = vmatprep.mubr.f32.mxu0 %v1274_v31 }
 0x18c   : > { %2297 = vmatmul.mubr.f32.gmra.mxu0 %v1275_v32 }
 0x18d   : > { %v2157_v33 = vpop.f32.mrf.mxu0 }
 0x18e   : > { %v2221_v34 = vpop.f32.mrf.mxu1 }
 0x18f   : > { %v820_v35 = vpop.f32.mrf.mxu0  ;;  %v1277_v38 = vmul.f32 %v2221_v34, %v2157_v33 }
 0x190   : > { %v1141_v36 = vpop.f32.mrf.mxu1 }
 0x191   : > { %v1276_v37 = vmul.f32 %v1141_v36, %v820_v35 }
 0x193   : > { %2299 = vmatprep.mubr.f32.mxu0 %v1276_v37 }
 0x194   : > { %2300 = vmatmul.mubr.f32.gmra.mxu0 %v1277_v38 }
 0x195   : > { %v2160_v39 = vpop.f32.mrf.mxu0 }
 0x196   : > { %v2224_v40 = vpop.f32.mrf.mxu1 }
 0x197   : > { %v830_v41 = vpop.f32.mrf.mxu0  ;;  %v1279_v45 = vmul.f32 %v2224_v40, %v2160_v39 }
 0x198   : > { %v1151_v42 = vpop.f32.mrf.mxu1 }
 0x199   : > { %v1278_v44 = vmul.f32 %v1151_v42, %v830_v41 }
 0x19b   : > { %2302 = vmatprep.mubr.f32.mxu0 %v1278_v44 }
 0x19c   : > { %2303 = vmatmul.mubr.f32.gmra.mxu0 %v1279_v45 }
 0x19d   : > { %v2163_v47 = vpop.f32.mrf.mxu0 }
 0x19e   : > { %v2227_v48 = vpop.f32.mrf.mxu1 }
 0x19f   : > { %v840_v49 = vpop.f32.mrf.mxu0  ;;  %v1281_v52 = vmul.f32 %v2227_v48, %v2163_v47 }
 0x1a0   : > { %v1161_v50 = vpop.f32.mrf.mxu1 }
 0x1a1   : > { %v1280_v51 = vmul.f32 %v1161_v50, %v840_v49 }
 0x1a3   : > { %2305 = vmatprep.mubr.f32.mxu0 %v1280_v51 }
 0x1a4   : > { %2306 = vmatmul.mubr.f32.gmra.mxu0 %v1281_v52 }
 0x1a5   : > { %v2166_v53 = vpop.f32.mrf.mxu0 }
 0x1a6   : > { %v2230_v54 = vpop.f32.mrf.mxu1 }
 0x1a7   : > { %v850_v55 = vpop.f32.mrf.mxu0  ;;  %v1283_v58 = vmul.f32 %v2230_v54, %v2166_v53 }
 0x1a8   : > { %v1171_v56 = vpop.f32.mrf.mxu1 }
 0x1a9   : > { %v1282_v57 = vmul.f32 %v1171_v56, %v850_v55 }
 0x1ab   : > { %2308 = vmatprep.mubr.f32.mxu0 %v1282_v57 }
 0x1ac   : > { %2309 = vmatmul.mubr.f32.gmra.mxu0 %v1283_v58 }
 0x1ad   : > { %v2169_v59 = vpop.f32.mrf.mxu0 }
 0x1ae   : > { %v2233_v60 = vpop.f32.mrf.mxu1 }
 0x1af   : > { %v860_v61 = vpop.f32.mrf.mxu0  ;;  %v1285_v0 = vmul.f32 %v2233_v60, %v2169_v59 }
 0x1b0   : > { %v1181_v62 = vpop.f32.mrf.mxu1 }
 0x1b1   : > { %v1284_v63 = vmul.f32 %v1181_v62, %v860_v61 }
 0x1b3   : > { %v2236_v15 = vpop.f32.mrf.mxu1  ;;  %2311 = vmatprep.mubr.f32.mxu0 %v1284_v63 }
 0x1b4   : > { %2312 = vmatmul.mubr.f32.gmra.mxu0 %v1285_v0  ;;  %v1287_v18 = vmul.f32 %v2236_v15, %v2977_v1 }
 0x1b5   : > { %v1191_v16 = vpop.f32.mrf.mxu1 }
 0x1b6   : > { %v1286_v17 = vmul.f32 %v1191_v16, %v2979_v2 }
 0x1b7   : > { %v2239_v19 = vpop.f32.mrf.mxu1 }
 0x1b8   : > { %2314 = vmatprep.mubr.f32.mxu0 %v1286_v17  ;;  %v1289_v22 = vmul.f32 %v2239_v19, %v2981_v3 }
 0x1b9   : > { %v1201_v20 = vpop.f32.mrf.mxu1  ;;  %2315 = vmatmul.mubr.f32.gmra.mxu0 %v1287_v18 }
 0x1ba   : > { %v1288_v21 = vmul.f32 %v1201_v20, %v2983_v4 }
 0x1bb   : > { %v2242_v23 = vpop.f32.mrf.mxu1 }
 0x1bc   : > { %2317 = vmatprep.mubr.f32.mxu0 %v1288_v21  ;;  %v1291_v26 = vmul.f32 %v2242_v23, %v2985_v5 }
 0x1bd   : > { %v1211_v24 = vpop.f32.mrf.mxu1  ;;  %2318 = vmatmul.mubr.f32.gmra.mxu0 %v1289_v22 }
 0x1be   : > { %v1290_v25 = vmul.f32 %v1211_v24, %v2987_v6 }
 0x1bf   : > { %v2245_v27 = vpop.f32.mrf.mxu1 }
 0x1c0   : > { %2320 = vmatprep.mubr.f32.mxu0 %v1290_v25  ;;  %v1293_v28 = vmul.f32 %v2245_v27, %v2989_v43 }
 0x1c1   : > { %v1221_v2 = vpop.f32.mrf.mxu1  ;;  %2321 = vmatmul.mubr.f32.gmra.mxu0 %v1291_v26 }
 0x1c2   : > { %v1292_v1 = vmul.f32 %v1221_v2, %v2991_v7 }
 0x1c3   : > { %v2248_v29 = vpop.f32.mrf.mxu1 }
 0x1c4   : > { %2323 = vmatprep.mubr.f32.mxu0 %v1292_v1  ;;  %v1295_v30 = vmul.f32 %v2248_v29, %v2993_v46 }
 0x1c5   : > { %v1231_v4 = vpop.f32.mrf.mxu1  ;;  %2324 = vmatmul.mubr.f32.gmra.mxu0 %v1293_v28 }
 0x1c6   : > { %v1294_v3 = vmul.f32 %v1231_v4, %v2995_v8 }
 0x1c7   : > { %v2251_v31 = vpop.f32.mrf.mxu1 }
 0x1c8   : > { %2326 = vmatprep.mubr.f32.mxu0 %v1294_v3  ;;  %v1297_v32 = vmul.f32 %v2251_v31, %v2997_v9  ;;  %v3028_v9 = vld [vmem:[%s3107_s3] ss:$0 sm:$0xff] }
 0x1c9   : > { %v1241_v6 = vpop.f32.mrf.mxu1  ;;  %2327 = vmatmul.mubr.f32.gmra.mxu0 %v1295_v30 }
 0x1ca   : > { %v1296_v5 = vmul.f32 %v1241_v6, %v2999_v10 }
 0x1cb   : > { %v2254_v33 = vpop.f32.mrf.mxu1 }
 0x1cc   : > { %2329 = vmatprep.mubr.f32.mxu0 %v1296_v5  ;;  %v1299_v34 = vmul.f32 %v2254_v33, %v3001_v11 }
 0x1cd   : > { %v1251_v7 = vpop.f32.mrf.mxu1  ;;  %2330 = vmatmul.mubr.f32.gmra.mxu0 %v1297_v32 }
 0x1ce   : > { %v1298_v43 = vmul.f32 %v1251_v7, %v3003_v12 }
 0x1cf   : > { %v2257_v35 = vpop.f32.mrf.mxu1 }
 0x1d0   : > { %2332 = vmatprep.mubr.f32.mxu0 %v1298_v43  ;;  %v1301_v36 = vmul.f32 %v2257_v35, %v3005_v13 }
 0x1d1   : > { %v1261_v8 = vpop.f32.mrf.mxu1  ;;  %2333 = vmatmul.mubr.f32.gmra.mxu0 %v1299_v34 }
 0x1d2   : > { %v1300_v46 = vmul.f32 %v1261_v8, %v3007_v14 }
 0x1d4   : > { %2335 = vmatprep.mubr.f32.mxu0 %v1300_v46 }
 0x1d5   : > { %2336 = vmatmul.mubr.f32.gmra.mxu0 %v1301_v36 }
 0x23c   : > { %v2292_v10 = vpop.f32.mrf.mxu0 }
 0x23d   : > { %v1397_v12 = vadd.f32 %v2292_v10, %v3028_v9 }
 0x23e   : > { %v1391_v37 = vpop.f32.mrf.mxu0 }
 0x23f   : > { %v1969_v11 = vmul.f32 -1.442695, %v1397_v12  ;;  %v1392_v38 = vadd.f32 %v3028_v9, %v1391_v37 }
 0x241   : > { %2369 = vpow2.f32 %v1969_v11  ;;  %v1968_v39 = vmul.f32 -1.442695, %v1392_v38 }
 0x243   : > { %2371 = vpow2.f32 %v1968_v39 }
 0x244   : > { %v2295_v14 = vpop.f32.mrf.mxu0 }
 0x245   : > { %v1407_v13 = vadd.f32 %v2295_v14, %v3028_v9 }
 0x246   : > { %v1401_v40 = vpop.f32.mrf.mxu0 }
 0x247   : > { %v1971_v41 = vmul.f32 -1.442695, %v1407_v13  ;;  %v1402_v42 = vadd.f32 %v3028_v9, %v1401_v40 }
 0x249   : > { %2373 = vpow2.f32 %v1971_v41  ;;  %v1970_v44 = vmul.f32 -1.442695, %v1402_v42 }
 0x24b   : > { %2375 = vpow2.f32 %v1970_v44 }
 0x24c   : > { %v2298_v45 = vpop.f32.mrf.mxu0 }
 0x24d   : > { %v1417_v47 = vadd.f32 %v2298_v45, %v3028_v9 }
 0x24e   : > { %v2370_v48 = vpop.eup %2369  ;;  %v1411_v49 = vpop.f32.mrf.mxu0 }
 0x24f   : > { %v1647_v50 = vadd.f32 1.0, %v2370_v48  ;;  %v1973_v51 = vmul.f32 -1.442695, %v1417_v47  ;;  %v1412_v52 = vadd.f32 %v3028_v9, %v1411_v49 }
 0x250   : > { %v2372_v53 = vpop.eup %2371 }
 0x251   : > { %2377 = vrcp.f32 %v1647_v50  ;;  %v1646_v54 = vadd.f32 1.0, %v2372_v53  ;;  %v1972_v55 = vmul.f32 -1.442695, %v1412_v52 }
 0x252   : > { %2379 = vpow2.f32 %v1973_v51 }
 0x253   : > { %2381 = vrcp.f32 %v1646_v54 }
 0x254   : > { %2383 = vpow2.f32 %v1972_v55  ;;  %v2301_v56 = vpop.f32.mrf.mxu0 }
 0x255   : > { %v1427_v57 = vadd.f32 %v2301_v56, %v3028_v9 }
 0x256   : > { %v2374_v58 = vpop.eup %2373  ;;  %v1421_v59 = vpop.f32.mrf.mxu0 }
 0x257   : > { %v1649_v60 = vadd.f32 1.0, %v2374_v58  ;;  %v1975_v61 = vmul.f32 -1.442695, %v1427_v57  ;;  %v1422_v62 = vadd.f32 %v3028_v9, %v1421_v59 }
 0x258   : > { %v2376_v63 = vpop.eup %2375 }
 0x259   : > { %2385 = vrcp.f32 %v1649_v60  ;;  %v1648_v0 = vadd.f32 1.0, %v2376_v63  ;;  %v1974_v15 = vmul.f32 -1.442695, %v1422_v62 }
 0x25a   : > { %2387 = vpow2.f32 %v1975_v61 }
 0x25b   : > { %2389 = vrcp.f32 %v1648_v0 }
 0x25c   : > { %2391 = vpow2.f32 %v1974_v15  ;;  %v2304_v16 = vpop.f32.mrf.mxu0 }
 0x25d   : > { %v1437_v17 = vadd.f32 %v2304_v16, %v3028_v9 }
 0x25e   : > { %v2378_v18 = vpop.eup %2377  ;;  %v1431_v19 = vpop.f32.mrf.mxu0 }
 0x25f   : > { %v2380_v20 = vpop.eup %2379  ;;  %1743 = vst [vmem:[%s3043_s28 + $0x8] sm:$0xff] %v2378_v18  ;;  %v1977_v21 = vmul.f32 -1.442695, %v1437_v17  ;;  %v1432_v22 = vadd.f32 %v3028_v9, %v1431_v19 }
 0x260   : > { %v2382_v23 = vpop.eup %2381  ;;  %v1651_v24 = vadd.f32 1.0, %v2380_v20 }
 0x261   : > { %v2384_v25 = vpop.eup %2383  ;;  %1742 = vst [vmem:[%s3043_s28] sm:$0xff] %v2382_v23  ;;  %2393 = vpow2.f32 %v1977_v21  ;;  %v1976_v26 = vmul.f32 -1.442695, %v1432_v22 }
 0x262   : > { %2395 = vrcp.f32 %v1651_v24  ;;  %v1650_v27 = vadd.f32 1.0, %v2384_v25 }
 0x263   : > { %2397 = vpow2.f32 %v1976_v26 }
 0x264   : > { %2399 = vrcp.f32 %v1650_v27  ;;  %v2307_v2 = vpop.f32.mrf.mxu0 }
 0x265   : > { %v1447_v1 = vadd.f32 %v2307_v2, %v3028_v9 }
 0x266   : > { %v2386_v28 = vpop.eup %2385  ;;  %v1441_v29 = vpop.f32.mrf.mxu0 }
 0x267   : > { %v2388_v4 = vpop.eup %2387  ;;  %1745 = vst [vmem:[%s3043_s28 + $0x18] sm:$0xff] %v2386_v28  ;;  %v1979_v3 = vmul.f32 -1.442695, %v1447_v1  ;;  %v1442_v30 = vadd.f32 %v3028_v9, %v1441_v29 }
 0x268   : > { %v2390_v31 = vpop.eup %2389  ;;  %v1653_v6 = vadd.f32 1.0, %v2388_v4 }
 0x269   : > { %v2392_v5 = vpop.eup %2391  ;;  %1744 = vst [vmem:[%s3043_s28 + $0x10] sm:$0xff] %v2390_v31  ;;  %2401 = vpow2.f32 %v1979_v3  ;;  %v1978_v32 = vmul.f32 -1.442695, %v1442_v30 }
 0x26a   : > { %2403 = vrcp.f32 %v1653_v6  ;;  %v1652_v33 = vadd.f32 1.0, %v2392_v5 }
 0x26b   : > { %2405 = vpow2.f32 %v1978_v32 }
 0x26c   : > { %2407 = vrcp.f32 %v1652_v33  ;;  %v2310_v7 = vpop.f32.mrf.mxu0 }
 0x26d   : > { %v1457_v43 = vadd.f32 %v2310_v7, %v3028_v9 }
 0x26e   : > { %v2394_v34 = vpop.eup %2393  ;;  %v1451_v35 = vpop.f32.mrf.mxu0 }
 0x26f   : > { %v2396_v8 = vpop.eup %2395  ;;  %v1655_v46 = vadd.f32 1.0, %v2394_v34  ;;  %v1981_v36 = vmul.f32 -1.442695, %v1457_v43  ;;  %v1452_v10 = vadd.f32 %v3028_v9, %v1451_v35 }
 0x270   : > { %v2398_v12 = vpop.eup %2397  ;;  %1747 = vst [vmem:[%s3043_s28 + $0x28] sm:$0xff] %v2396_v8 }
 0x271   : > { %v2400_v37 = vpop.eup %2399  ;;  %2409 = vrcp.f32 %v1655_v46  ;;  %v1654_v11 = vadd.f32 1.0, %v2398_v12  ;;  %v1980_v38 = vmul.f32 -1.442695, %v1452_v10 }
 0x272   : > { %1746 = vst [vmem:[%s3043_s28 + $0x20] sm:$0xff] %v2400_v37  ;;  %2411 = vpow2.f32 %v1981_v36 }
 0x273   : > { %2413 = vrcp.f32 %v1654_v11 }
 0x274   : > { %2415 = vpow2.f32 %v1980_v38  ;;  %v2313_v39 = vpop.f32.mrf.mxu0 }
 0x275   : > { %v1467_v14 = vadd.f32 %v2313_v39, %v3028_v9 }
 0x276   : > { %v2402_v13 = vpop.eup %2401  ;;  %v1461_v40 = vpop.f32.mrf.mxu0 }
 0x277   : > { %v2404_v41 = vpop.eup %2403  ;;  %v1657_v42 = vadd.f32 1.0, %v2402_v13  ;;  %v1983_v44 = vmul.f32 -1.442695, %v1467_v14  ;;  %v1462_v45 = vadd.f32 %v3028_v9, %v1461_v40 }
 0x278   : > { %v2406_v47 = vpop.eup %2405  ;;  %1749 = vst [vmem:[%s3043_s28 + $0x38] sm:$0xff] %v2404_v41 }
 0x279   : > { %v2408_v48 = vpop.eup %2407  ;;  %2417 = vrcp.f32 %v1657_v42  ;;  %v1656_v49 = vadd.f32 1.0, %v2406_v47  ;;  %v1982_v50 = vmul.f32 -1.442695, %v1462_v45  ;;  %v2316_v51 = vpop.f32.mrf.mxu0 }
 0x27a   : > { %1748 = vst [vmem:[%s3043_s28 + $0x30] sm:$0xff] %v2408_v48  ;;  %2419 = vpow2.f32 %v1983_v44  ;;  %v1477_v52 = vadd.f32 %v2316_v51, %v3028_v9 }
 0x27b   : > { %2421 = vrcp.f32 %v1656_v49  ;;  %v1471_v53 = vpop.f32.mrf.mxu0 }
 0x27c   : > { %2423 = vpow2.f32 %v1982_v50  ;;  %v1985_v54 = vmul.f32 -1.442695, %v1477_v52  ;;  %v1472_v55 = vadd.f32 %v3028_v9, %v1471_v53 }
 0x27d   : > { %v2319_v56 = vpop.f32.mrf.mxu0 }
 0x27e   : > { %v2410_v57 = vpop.eup %2409  ;;  %2425 = vpow2.f32 %v1985_v54  ;;  %v1984_v58 = vmul.f32 -1.442695, %v1472_v55  ;;  %v1487_v59 = vadd.f32 %v2319_v56, %v3028_v9 }
 0x27f   : > { %v2412_v60 = vpop.eup %2411  ;;  %1751 = vst [vmem:[%s3043_s28 + $0x48] sm:$0xff] %v2410_v57  ;;  %v1481_v61 = vpop.f32.mrf.mxu0 }
 0x280   : > { %v2414_v62 = vpop.eup %2413  ;;  %v1659_v63 = vadd.f32 1.0, %v2412_v60  ;;  %2427 = vpow2.f32 %v1984_v58  ;;  %v1987_v0 = vmul.f32 -1.442695, %v1487_v59  ;;  %v1482_v15 = vadd.f32 %v3028_v9, %v1481_v61 }
 0x281   : > { %v2416_v16 = vpop.eup %2415  ;;  %1750 = vst [vmem:[%s3043_s28 + $0x40] sm:$0xff] %v2414_v62  ;;  %v2322_v17 = vpop.f32.mrf.mxu0 }
 0x282   : > { %2429 = vrcp.f32 %v1659_v63  ;;  %v1658_v18 = vadd.f32 1.0, %v2416_v16  ;;  %v1986_v19 = vmul.f32 -1.442695, %v1482_v15  ;;  %v1497_v20 = vadd.f32 %v2322_v17, %v3028_v9 }
 0x283   : > { %2431 = vpow2.f32 %v1987_v0  ;;  %v1491_v21 = vpop.f32.mrf.mxu0 }
 0x284   : > { %2433 = vrcp.f32 %v1658_v18  ;;  %v1989_v22 = vmul.f32 -1.442695, %v1497_v20  ;;  %v1492_v23 = vadd.f32 %v3028_v9, %v1491_v21 }
 0x285   : > { %2435 = vpow2.f32 %v1986_v19  ;;  %v2325_v24 = vpop.f32.mrf.mxu0 }
 0x286   : > { %v2418_v25 = vpop.eup %2417  ;;  %2437 = vpow2.f32 %v1989_v22  ;;  %v1988_v26 = vmul.f32 -1.442695, %v1492_v23  ;;  %v1507_v27 = vadd.f32 %v2325_v24, %v3028_v9 }
 0x287   : > { %v2420_v2 = vpop.eup %2419  ;;  %1753 = vst [vmem:[%s3043_s28 + $0x58] sm:$0xff] %v2418_v25  ;;  %v1501_v1 = vpop.f32.mrf.mxu0 }
 0x288   : > { %v2422_v28 = vpop.eup %2421  ;;  %v1661_v29 = vadd.f32 1.0, %v2420_v2  ;;  %2439 = vpow2.f32 %v1988_v26  ;;  %v1991_v4 = vmul.f32 -1.442695, %v1507_v27  ;;  %v1502_v3 = vadd.f32 %v3028_v9, %v1501_v1 }
 0x289   : > { %v2424_v30 = vpop.eup %2423  ;;  %1752 = vst [vmem:[%s3043_s28 + $0x50] sm:$0xff] %v2422_v28  ;;  %v2328_v31 = vpop.f32.mrf.mxu0 }
 0x28a   : > { %2441 = vrcp.f32 %v1661_v29  ;;  %v1660_v6 = vadd.f32 1.0, %v2424_v30  ;;  %v1990_v5 = vmul.f32 -1.442695, %v1502_v3  ;;  %v1517_v32 = vadd.f32 %v2328_v31, %v3028_v9 }
 0x28b   : > { %v2426_v33 = vpop.eup %2425  ;;  %2443 = vpow2.f32 %v1991_v4  ;;  %v1511_v7 = vpop.f32.mrf.mxu0 }
 0x28c   : > { %2445 = vrcp.f32 %v1660_v6  ;;  %v1663_v43 = vadd.f32 1.0, %v2426_v33  ;;  %v1993_v34 = vmul.f32 -1.442695, %v1517_v32  ;;  %v1512_v35 = vadd.f32 %v3028_v9, %v1511_v7 }
 0x28d   : > { %v2428_v8 = vpop.eup %2427  ;;  %2447 = vpow2.f32 %v1990_v5  ;;  %v2331_v46 = vpop.f32.mrf.mxu0 }
 0x28e   : > { %2449 = vrcp.f32 %v1663_v43  ;;  %v1662_v36 = vadd.f32 1.0, %v2428_v8  ;;  %v1992_v10 = vmul.f32 -1.442695, %v1512_v35  ;;  %v1527_v12 = vadd.f32 %v2331_v46, %v3028_v9 }
 0x28f   : > { %v2430_v37 = vpop.eup %2429  ;;  %2451 = vpow2.f32 %v1993_v34  ;;  %v1521_v11 = vpop.f32.mrf.mxu0 }
 0x290   : > { %v2432_v38 = vpop.eup %2431  ;;  %1755 = vst [vmem:[%s3043_s28 + $0x68] sm:$0xff] %v2430_v37  ;;  %2453 = vrcp.f32 %v1662_v36  ;;  %v1995_v39 = vmul.f32 -1.442695, %v1527_v12  ;;  %v1522_v14 = vadd.f32 %v3028_v9, %v1521_v11 }
 0x291   : > { %v2434_v13 = vpop.eup %2433  ;;  %v1665_v40 = vadd.f32 1.0, %v2432_v38  ;;  %2455 = vpow2.f32 %v1992_v10  ;;  %v2334_v41 = vpop.f32.mrf.mxu0 }
 0x292   : > { %v2436_v42 = vpop.eup %2435  ;;  %1754 = vst [vmem:[%s3043_s28 + $0x60] sm:$0xff] %v2434_v13  ;;  %2457 = vpow2.f32 %v1995_v39  ;;  %v1994_v44 = vmul.f32 -1.442695, %v1522_v14  ;;  %v1537_v45 = vadd.f32 %v2334_v41, %v3028_v9 }
 0x293   : > { %v2438_v47 = vpop.eup %2437  ;;  %2459 = vrcp.f32 %v1665_v40  ;;  %v1664_v48 = vadd.f32 1.0, %v2436_v42  ;;  %v1531_v49 = vpop.f32.mrf.mxu0 }
 0x294   : > { %v1667_v50 = vadd.f32 1.0, %v2438_v47  ;;  %2461 = vpow2.f32 %v1994_v44  ;;  %v1997_v51 = vmul.f32 -1.442695, %v1537_v45  ;;  %v1532_v52 = vadd.f32 %v3028_v9, %v1531_v49 }
 0x295   : > { %v2440_v53 = vpop.eup %2439  ;;  %2463 = vrcp.f32 %v1664_v48  ;;  %v2337_v54 = vpop.f32.mrf.mxu0 }
 0x296   : > { %2465 = vrcp.f32 %v1667_v50  ;;  %v1666_v55 = vadd.f32 1.0, %v2440_v53  ;;  %v1996_v56 = vmul.f32 -1.442695, %v1532_v52  ;;  %v1547_v57 = vadd.f32 %v2337_v54, %v3028_v9 }
 0x297   : > { %v2442_v58 = vpop.eup %2441  ;;  %2467 = vpow2.f32 %v1997_v51  ;;  %v1541_v59 = vpop.f32.mrf.mxu0 }
 0x298   : > { %v2444_v60 = vpop.eup %2443  ;;  %1757 = vst [vmem:[%s3043_s28 + $0x78] sm:$0xff] %v2442_v58  ;;  %2469 = vrcp.f32 %v1666_v55  ;;  %v1999_v61 = vmul.f32 -1.442695, %v1547_v57  ;;  %v1542_v62 = vadd.f32 %v3028_v9, %v1541_v59 }
 0x299   : > { %v2446_v63 = vpop.eup %2445  ;;  %v1669_v0 = vadd.f32 1.0, %v2444_v60  ;;  %2471 = vpow2.f32 %v1996_v56 }
 0x29a   : > { %v2448_v15 = vpop.eup %2447  ;;  %1756 = vst [vmem:[%s3043_s28 + $0x70] sm:$0xff] %v2446_v63  ;;  %2473 = vpow2.f32 %v1999_v61  ;;  %v1998_v16 = vmul.f32 -1.442695, %v1542_v62 }
 0x29b   : > { %v2450_v17 = vpop.eup %2449  ;;  %2475 = vrcp.f32 %v1669_v0  ;;  %v1668_v18 = vadd.f32 1.0, %v2448_v15 }
 0x29c   : > { %v2452_v19 = vpop.eup %2451  ;;  %1759 = vst [vmem:[%s3043_s28 + $0x88] sm:$0xff] %v2450_v17  ;;  %2477 = vpow2.f32 %v1998_v16 }
 0x29d   : > { %v2454_v20 = vpop.eup %2453  ;;  %2479 = vrcp.f32 %v1668_v18  ;;  %v1671_v21 = vadd.f32 1.0, %v2452_v19 }
 0x29e   : > { %v2456_v9 = vpop.eup %2455  ;;  %1758 = vst [vmem:[%s3043_s28 + $0x80] sm:$0xff] %v2454_v20 }
 0x29f   : > { %v2458_v22 = vpop.eup %2457  ;;  %2481 = vrcp.f32 %v1671_v21  ;;  %v1670_v23 = vadd.f32 1.0, %v2456_v9 }
 0x2a0   : > { %v2460_v24 = vpop.eup %2459  ;;  %v1673_v25 = vadd.f32 1.0, %v2458_v22 }
 0x2a1   : > { %v2462_v26 = vpop.eup %2461  ;;  %1761 = vst [vmem:[%s3043_s28 + $0x98] sm:$0xff] %v2460_v24  ;;  %2483 = vrcp.f32 %v1670_v23 }
 0x2a2   : > { %v2464_v27 = vpop.eup %2463  ;;  %2485 = vrcp.f32 %v1673_v25  ;;  %v1672_v2 = vadd.f32 1.0, %v2462_v26 }
 0x2a3   : > { %v2466_v1 = vpop.eup %2465  ;;  %1760 = vst [vmem:[%s3043_s28 + $0x90] sm:$0xff] %v2464_v27 }
 0x2a4   : > { %v2468_v28 = vpop.eup %2467  ;;  %1763 = vst [vmem:[%s3043_s28 + $0xa8] sm:$0xff] %v2466_v1  ;;  %2487 = vrcp.f32 %v1672_v2 }
 0x2a5   : > { %v2470_v29 = vpop.eup %2469  ;;  %v1675_v4 = vadd.f32 1.0, %v2468_v28 }
 0x2a6   : > { %v2472_v3 = vpop.eup %2471  ;;  %1762 = vst [vmem:[%s3043_s28 + $0xa0] sm:$0xff] %v2470_v29 }
 0x2a7   : > { %v2474_v30 = vpop.eup %2473  ;;  %2489 = vrcp.f32 %v1675_v4  ;;  %v1674_v31 = vadd.f32 1.0, %v2472_v3 }
 0x2a8   : > { %v2476_v6 = vpop.eup %2475  ;;  %v1677_v5 = vadd.f32 1.0, %v2474_v30 }
 0x2a9   : > { %v2478_v32 = vpop.eup %2477  ;;  %1765 = vst [vmem:[%s3043_s28 + $0xb8] sm:$0xff] %v2476_v6  ;;  %2491 = vrcp.f32 %v1674_v31 }
 0x2aa   : > { %v2480_v33 = vpop.eup %2479  ;;  %2493 = vrcp.f32 %v1677_v5  ;;  %v1676_v7 = vadd.f32 1.0, %v2478_v32 }
 0x2ab   : > { %1764 = vst [vmem:[%s3043_s28 + $0xb0] sm:$0xff] %v2480_v33 }
 0x2ac   : > { %v2482_v43 = vpop.eup %2481  ;;  %2495 = vrcp.f32 %v1676_v7 }
 0x2ad   : > { %1767 = vst [vmem:[%s3043_s28 + $0xc8] sm:$0xff] %v2482_v43 }
 0x2ae   : > { %v2484_v34 = vpop.eup %2483 }
 0x2af   : > { %v2486_v35 = vpop.eup %2485  ;;  %1766 = vst [vmem:[%s3043_s28 + $0xc0] sm:$0xff] %v2484_v34 }
 0x2b0   : > { %1769 = vst [vmem:[%s3043_s28 + $0xd8] sm:$0xff] %v2486_v35 }
 0x2b1   : > { %v2488_v8 = vpop.eup %2487 }
 0x2b2   : > { %1768 = vst [vmem:[%s3043_s28 + $0xd0] sm:$0xff] %v2488_v8 }
 0x2b4   : > { %v2490_v46 = vpop.eup %2489 }
 0x2b5   : > { %1771 = vst [vmem:[%s3043_s28 + $0xe8] sm:$0xff] %v2490_v46 }
 0x2b6   : > { %v2492_v36 = vpop.eup %2491 }
 0x2b7   : > { %v2494_v10 = vpop.eup %2493  ;;  %1770 = vst [vmem:[%s3043_s28 + $0xe0] sm:$0xff] %v2492_v36 }
 0x2b8   : > { %1773 = vst [vmem:[%s3043_s28 + $0xf8] sm:$0xff] %v2494_v10 }
 0x2b9   : > { %v2496_v12 = vpop.eup %2495 }
 0x2ba   : > { %1772 = vst [vmem:[%s3043_s28 + $0xf0] sm:$0xff] %v2496_v12 }
 0x2bb PF: > { %s14_s15 = sadd.s32 1, %s2503_s15  }
 0x2bc   : > { %p11_p4 = scmp.ge.s32.totalorder %s14_s15, 4  }
 0x2be   :  { %13 = sbr.rel (!%p11_p4) target bundleno = 1 (0x1), region = 66 }

</bundles_post_ra>
